<compile_context>
chip_gen: v7x
topology: tpu7x:2x2x1
jax: 0.10.0
libtpu: 0.0.40
codegen_flags: <defaults>
</compile_context>

<pallas_src>
import functools

import jax
import jax.numpy as jnp
from jax.experimental import pallas as pl
from jax.experimental.pallas import tpu as pltpu


def _round_up(x: int, m: int) -> int:
    return ((x + m - 1) // m) * m


def _choose_tile_n(n: int, tile_n_max: int) -> int:
    # Aim for >= 8 grid steps (>= 4 per TensorCore on 2-core chips) so the
    # BlockSpec pipeline overlaps DMA with compute, but cap the tile so the
    # double-buffered f32 x tile stays comfortably inside scoped VMEM on all
    # generations (v5e default 16 MiB).
    target_steps = 8
    tile = _round_up(max((n + target_steps - 1) // target_steps, 1), 16)
    return max(16, min(tile_n_max, tile))


def mlp_kernel(x_ref, w1_ref, b1_ref, w2_ref, b2_ref, o_ref):
    # x_ref: (tile_n, 784) f32 -- one batch tile, streamed per grid step.
    # w*/b* refs: full (padded) weights/biases, VMEM-resident across steps.
    x = x_ref[...].astype(jnp.bfloat16)                      # VPU cast (free slot)
    h = jnp.dot(x, w1_ref[...],
                preferred_element_type=jnp.float32)          # MXU, f32 acc
    h = jnp.maximum(h + b1_ref[...], 0.0)                    # bias + ReLU (f32)
    y = jnp.dot(h.astype(jnp.bfloat16), w2_ref[...],
                preferred_element_type=jnp.float32)          # MXU, f32 acc
    o_ref[...] = (y + b2_ref[...]).astype(o_ref.dtype)       # lane-dense bf16 store


@functools.partial(jax.jit, static_argnames=("tile_n_max",))
def neural_network_forward(x_nchw, w1, b1, w2, b2, *, tile_n_max: int = 1024):
    """Equivalent of NeuralNetwork.forward: flatten -> linear1 -> relu -> linear2."""
    n = x_nchw.shape[0]
    x_flat = x_nchw.reshape(n, -1).astype(jnp.float32)       # nn.Flatten -> (N, 784)
    d_in = x_flat.shape[1]
    d_hid = w1.shape[1]
    d_out = w2.shape[1]
    d_out_p = _round_up(d_out, 128)                          # 10 -> 128 (lane-dense)

    tile_n = _choose_tile_n(n, tile_n_max)
    grid_n = pl.cdiv(n, tile_n)                              # last block overhangs

    # Tiny one-time weight/bias prep (bf16 weights, f32 biases, pad 10 -> 128).
    w1_p = w1.astype(jnp.bfloat16)                           # (784, 128)
    b1_p = b1.reshape(1, d_hid).astype(jnp.float32)          # (1, 128)
    w2_p = jnp.zeros((d_hid, d_out_p), jnp.bfloat16)
    w2_p = w2_p.at[:, :d_out].set(w2.astype(jnp.bfloat16))   # (128, 128)
    b2_p = jnp.zeros((1, d_out_p), jnp.float32)
    b2_p = b2_p.at[:, :d_out].set(b2.reshape(1, d_out).astype(jnp.float32))

    cost = pl.CostEstimate(
        flops=2 * n * d_in * d_hid + 2 * n * d_hid * d_out_p,
        transcendentals=0,
        bytes_accessed=(x_flat.size * 4 + w1_p.size * 2 + w2_p.size * 2
                        + b1_p.size * 4 + b2_p.size * 4
                        + n * d_out_p * 2),
    )

    out_padded = pl.pallas_call(
        mlp_kernel,
        out_shape=jax.ShapeDtypeStruct((n, d_out_p), jnp.bfloat16),
        grid_spec=pltpu.PrefetchScalarGridSpec(
            num_scalar_prefetch=0,
            grid=(grid_n,),
            in_specs=[
                # Batch tile streams through the pipeline (f32, unpadded).
                pl.BlockSpec((tile_n, d_in), lambda i: (i, 0)),
                # Weights / biases: same block every step -> VMEM resident.
                pl.BlockSpec((d_in, d_hid), lambda i: (0, 0)),
                pl.BlockSpec((1, d_hid), lambda i: (0, 0)),
                pl.BlockSpec((d_hid, d_out_p), lambda i: (0, 0)),
                pl.BlockSpec((1, d_out_p), lambda i: (0, 0)),
            ],
            out_specs=pl.BlockSpec((tile_n, d_out_p), lambda i: (i, 0)),
        ),
        compiler_params=pltpu.CompilerParams(
            dimension_semantics=("parallel",)),
        cost_estimate=cost,
    )(x_flat, w1_p, b1_p, w2_p, b2_p)

    # Strip output-lane padding; return f32 to match the PyTorch module's dtype.
    return out_padded[:, :d_out].astype(jnp.float32)


def init_params(key):
    """Deterministic parameter init matching nn.Linear shapes (stored transposed)."""
    k1, k2, k3, k4 = jax.random.split(key, 4)
    d_in, d_hid, d_out = 28 * 28, 128, 10
    # PyTorch Linear default: U(-1/sqrt(fan_in), 1/sqrt(fan_in))
    lim1 = 1.0 / jnp.sqrt(d_in)
    lim2 = 1.0 / jnp.sqrt(d_hid)
    w1 = jax.random.uniform(k1, (d_in, d_hid), jnp.float32, -lim1, lim1)
    b1 = jax.random.uniform(k2, (1, d_hid), jnp.float32, -lim1, lim1)
    w2 = jax.random.uniform(k3, (d_hid, d_out), jnp.float32, -lim2, lim2)
    b2 = jax.random.uniform(k4, (1, d_out), jnp.float32, -lim2, lim2)
    return w1, b1, w2, b2


if __name__ == "__main__":
    key = jax.random.PRNGKey(0)
    kx, kp = jax.random.split(key)
    # MNIST-style input: batch=2, 1 channel, 28x28 (NCHW like PyTorch)
    x = jax.random.normal(kx, (2, 1, 28, 28), dtype=jnp.float32)
    w1, b1, w2, b2 = init_params(kp)

    out = neural_network_forward(x, w1, b1, w2, b2)
    out = jax.block_until_ready(out)

    # Reference check in plain JAX (f32). Tolerance accounts for the bf16
    # input/weight/hidden casts and bf16 output store (accumulation is f32).
    ref = jnp.maximum(x.reshape(2, -1) @ w1 + b1, 0.0) @ w2 + b2
    assert out.shape == (2, 10)
    assert jnp.allclose(out, ref, atol=3e-2, rtol=3e-2), (
        f"max abs err {jnp.max(jnp.abs(out - ref))}")
    print("KERNEL_OK")
</pallas_src>

<mosaic_0001>
module attributes {stable_mosaic.version = 11 : i64} {
  func.func @mlp_kernel(%arg0: i32, %arg1: memref<16x784xf32, #tpu.memory_space<vmem>>, %arg2: memref<784x128xbf16, #tpu.memory_space<vmem>>, %arg3: memref<1x128xf32, #tpu.memory_space<vmem>>, %arg4: memref<128x128xbf16, #tpu.memory_space<vmem>>, %arg5: memref<1x128xf32, #tpu.memory_space<vmem>>, %arg6: memref<16x128xbf16, #tpu.memory_space<vmem>>) attributes {dimension_semantics = [#tpu.dimension_semantics<parallel>], iteration_bounds = array<i64: 1>, scalar_prefetch = 0 : i64, scratch_operands = 0 : i64, tpu.core_type = #tpu.core_type<tc>, window_params = [{transform_indices = @transform_0, window_bounds = array<i64: 16, 784>}, {pipeline_mode = #tpu.pipeline_mode<synchronous>, transform_indices = @transform_1, window_bounds = array<i64: 784, 128>}, {pipeline_mode = #tpu.pipeline_mode<synchronous>, transform_indices = @transform_2, window_bounds = array<i64: 1, 128>}, {pipeline_mode = #tpu.pipeline_mode<synchronous>, transform_indices = @transform_3, window_bounds = array<i64: 128, 128>}, {pipeline_mode = #tpu.pipeline_mode<synchronous>, transform_indices = @transform_4, window_bounds = array<i64: 1, 128>}, {transform_indices = @transform_5, window_bounds = array<i64: 16, 128>}]} {
    %c0 = arith.constant 0 : index
    %c0_0 = arith.constant 0 : index
    %0 = vector.load %arg1[%c0, %c0_0] : memref<16x784xf32, #tpu.memory_space<vmem>>, vector<16x784xf32>
    %1 = arith.truncf %0 : vector<16x784xf32> to vector<16x784xbf16>
    %c0_1 = arith.constant 0 : index
    %c0_2 = arith.constant 0 : index
    %2 = vector.load %arg2[%c0_1, %c0_2] : memref<784x128xbf16, #tpu.memory_space<vmem>>, vector<784x128xbf16>
    %cst = arith.constant dense<0.000000e+00> : vector<16x128xf32>
    %3 = tpu.matmul %1, %2, %cst {dimension_numbers = #tpu.dot_dimension_numbers<[1], [0], [0], [1], [0, 0, 1, 1], [], []>} : vector<16x784xbf16>, vector<784x128xbf16>, vector<16x128xf32> -> vector<16x128xf32>
    %c0_3 = arith.constant 0 : index
    %c0_4 = arith.constant 0 : index
    %4 = vector.load %arg3[%c0_3, %c0_4] : memref<1x128xf32, #tpu.memory_space<vmem>>, vector<1x128xf32>
    %5 = vector.broadcast %4 : vector<1x128xf32> to vector<16x128xf32>
    %6 = arith.addf %3, %5 : vector<16x128xf32>
    %cst_5 = arith.constant 0.000000e+00 : f32
    %7 = vector.broadcast %cst_5 : f32 to vector<16x128xf32>
    %8 = arith.maximumf %6, %7 : vector<16x128xf32>
    %9 = arith.truncf %8 : vector<16x128xf32> to vector<16x128xbf16>
    %c0_6 = arith.constant 0 : index
    %c0_7 = arith.constant 0 : index
    %10 = vector.load %arg4[%c0_6, %c0_7] : memref<128x128xbf16, #tpu.memory_space<vmem>>, vector<128x128xbf16>
    %cst_8 = arith.constant dense<0.000000e+00> : vector<16x128xf32>
    %11 = tpu.matmul %9, %10, %cst_8 {dimension_numbers = #tpu.dot_dimension_numbers<[1], [0], [0], [1], [0, 0, 1, 1], [], []>} : vector<16x128xbf16>, vector<128x128xbf16>, vector<16x128xf32> -> vector<16x128xf32>
    %c0_9 = arith.constant 0 : index
    %c0_10 = arith.constant 0 : index
    %12 = vector.load %arg5[%c0_9, %c0_10] : memref<1x128xf32, #tpu.memory_space<vmem>>, vector<1x128xf32>
    %13 = vector.broadcast %12 : vector<1x128xf32> to vector<16x128xf32>
    %14 = arith.addf %11, %13 : vector<16x128xf32>
    %15 = arith.truncf %14 : vector<16x128xf32> to vector<16x128xbf16>
    %c0_11 = arith.constant 0 : index
    %c0_12 = arith.constant 0 : index
    %16 = vector.load %arg6[%c0_11, %c0_12] : memref<16x128xbf16, #tpu.memory_space<vmem>>, vector<16x128xbf16>
    tpu.vector_store %arg6[%c0_11, %c0_12], %15 {strides = array<i32>} : memref<16x128xbf16, #tpu.memory_space<vmem>>, vector<16x128xbf16>,
    return
  }
  func.func @transform_0(%arg0: i32) -> (i32, i32) {
    %c0_i32 = arith.constant 0 : i32
    %c0_i32_0 = arith.constant 0 : i32
    return %arg0, %c0_i32 : i32, i32
  }
  func.func @transform_1(%arg0: i32) -> (i32, i32) {
    %c0_i32 = arith.constant 0 : i32
    %c0_i32_0 = arith.constant 0 : i32
    %c0_i32_1 = arith.constant 0 : i32
    return %c0_i32, %c0_i32_0 : i32, i32
  }
  func.func @transform_2(%arg0: i32) -> (i32, i32) {
    %c0_i32 = arith.constant 0 : i32
    %c0_i32_0 = arith.constant 0 : i32
    %c0_i32_1 = arith.constant 0 : i32
    return %c0_i32, %c0_i32_0 : i32, i32
  }
  func.func @transform_3(%arg0: i32) -> (i32, i32) {
    %c0_i32 = arith.constant 0 : i32
    %c0_i32_0 = arith.constant 0 : i32
    %c0_i32_1 = arith.constant 0 : i32
    return %c0_i32, %c0_i32_0 : i32, i32
  }
  func.func @transform_4(%arg0: i32) -> (i32, i32) {
    %c0_i32 = arith.constant 0 : i32
    %c0_i32_0 = arith.constant 0 : i32
    %c0_i32_1 = arith.constant 0 : i32
    return %c0_i32, %c0_i32_0 : i32, i32
  }
  func.func @transform_5(%arg0: i32) -> (i32, i32) {
    %c0_i32 = arith.constant 0 : i32
    %c0_i32_0 = arith.constant 0 : i32
    return %arg0, %c0_i32 : i32, i32
  }
}

</mosaic_0001>

<bundles_post_ra>
// kernel: neural_network_forward.1
= control target key start
LH: loop header
LB: loop body
LE: loop exit
PB: predicated region body
PF: predicated region fallthrough
CT: control target
= control target key end

     0   :  { %v60_v29 = vlaneseq  ;;  %v1257_v32 = vmov 1983009808   ;;  %v1258_v54 = vmov 0.0   ;;  %vm1259_vm0 = vmmov 0   ;;  %s1555_s0 = inlined_call_operand.vmem [shape: f32[2,784], index: 0, kind: input, shape index: {}]   ;;  %s1556_s1 = inlined_call_operand.vmem [shape: bf16[784,128], index: 1, kind: input, shape index: {}]   ;;  %s1557_s2 = inlined_call_operand.vmem [shape: f32[1,128], index: 2, kind: input, shape index: {}]   ;;  %s1558_s3 = inlined_call_operand.vmem [shape: bf16[128,128], index: 3, kind: input, shape index: {}]   ;;  %s1559_s4 = inlined_call_operand.vmem [shape: f32[1,128], index: 4, kind: input, shape index: {}]   ;;  %s1560_s5 = inlined_call_operand.vmem [shape: bf16[2,128], index: 5, kind: output, shape index: {}]  }
   0x1   :  { %v1176_v0 = vld [vmem:[%s1556_s1 + $0x40] sm:$0xff]   ;;  %v1180_v4 = vld [vmem:[%s1556_s1 + $0x48] sm:$0xff]   ;;  %v1184_v8 = vld [vmem:[%s1556_s1 + $0x50] sm:$0xff]   ;;  %v58_v33 = vunpack.c.l.s4 %v1257_v32  ;;  %vm615_vm1 = vcmask 130048  }
   0x2   :  { %v1177_v1 = vld [vmem:[%s1556_s1] sm:$0xff]   ;;  %1069 = vmatprep.subr.bf16.mxu0 %v1176_v0  ;;  %v1181_v5 = vld [vmem:[%s1556_s1 + $0x8] sm:$0xff]   ;;  %v1185_v9 = vld [vmem:[%s1556_s1 + $0x10] sm:$0xff]   ;;  %v1384_v34 = vshrl.u32 %v60_v29, 7 }
   0x3   :  { %v1178_v2 = vld [vmem:[%s1556_s1 + $0xc0] sm:$0xff]   ;;  %1070 = vmatpush3.bf16.msra.mxu0 %v1177_v1  ;;  %v1182_v6 = vld [vmem:[%s1556_s1 + $0xc8] sm:$0xff]   ;;  %v1186_v10 = vld [vmem:[%s1556_s1 + $0xd0] sm:$0xff]   ;;  %v59_v37 = vunpack.c.0.s8 %v58_v33 }
   0x4   :  { %v1179_v3 = vld [vmem:[%s1556_s1 + $0x80] sm:$0xff]   ;;  %1091 = vmatprep.subr.bf16.mxu1 %v1178_v2  ;;  %1071 = vmatprep.subr.bf16.mxu0 %v1180_v4  ;;  %v1183_v7 = vld [vmem:[%s1556_s1 + $0x88] sm:$0xff]   ;;  %v1187_v11 = vld [vmem:[%s1556_s1 + $0x90] sm:$0xff]  }
   0x5   :  { %1092 = vmatpush3.bf16.msra.mxu1 %v1179_v3  ;;  %v1188_v12 = vld [vmem:[%s1556_s1 + $0x58] sm:$0xff]   ;;  %v1192_v16 = vld [vmem:[%s1556_s1 + $0x60] sm:$0xff]   ;;  %v1196_v20 = vld [vmem:[%s1556_s1 + $0x68] sm:$0xff]   ;;  %v1402_v41 = vsub.s32 %v59_v37, %v1384_v34 }
   0x6   :  { %1093 = vmatprep.subr.bf16.mxu1 %v1182_v6  ;;  %v1189_v13 = vld [vmem:[%s1556_s1 + $0x18] sm:$0xff]   ;;  %v1193_v17 = vld [vmem:[%s1556_s1 + $0x20] sm:$0xff]   ;;  %v1197_v21 = vld [vmem:[%s1556_s1 + $0x28] sm:$0xff]  }
   0x7   :  { %1072 = vmatpush3.bf16.msra.mxu0 %v1181_v5  ;;  %v1190_v14 = vld [vmem:[%s1556_s1 + $0xd8] sm:$0xff]   ;;  %v1194_v18 = vld [vmem:[%s1556_s1 + $0xe0] sm:$0xff]   ;;  %v1198_v22 = vld [vmem:[%s1556_s1 + $0xe8] sm:$0xff]  }
   0x8   :  { %1073 = vmatprep.subr.bf16.mxu0 %v1184_v8  ;;  %v1191_v15 = vld [vmem:[%s1556_s1 + $0x98] sm:$0xff]   ;;  %v1195_v19 = vld [vmem:[%s1556_s1 + $0xa0] sm:$0xff]   ;;  %v1199_v23 = vld [vmem:[%s1556_s1 + $0xa8] sm:$0xff]  }
   0x9   :  { %1094 = vmatpush3.bf16.msra.mxu1 %v1183_v7  ;;  %v1200_v24 = vld [vmem:[%s1556_s1 + $0x70] sm:$0xff]   ;;  %v1204_v28 = vld [vmem:[%s1556_s1 + $0x78] sm:$0xff]   ;;  %v1216_v42 = vld [vmem:[%s1556_s1 + $0x140] sm:$0xff]  }
   0xa   :  { %1095 = vmatprep.subr.bf16.mxu1 %v1186_v10  ;;  %v1201_v25 = vld [vmem:[%s1556_s1 + $0x30] sm:$0xff]   ;;  %v1205_v30 = vld [vmem:[%s1556_s1 + $0x38] sm:$0xff]   ;;  %v1221_v0 = vld [vmem:[%s1556_s1 + $0x100] sm:$0xff]  }
   0xb   :  { %1074 = vmatpush3.bf16.msra.mxu0 %v1185_v9  ;;  %v1202_v26 = vld [vmem:[%s1556_s1 + $0xf0] sm:$0xff]   ;;  %v1206_v31 = vld [vmem:[%s1556_s1 + $0xf8] sm:$0xff]   ;;  %v1222_v3 = vld [vmem:[%s1556_s1 + $0x148] sm:$0xff]  }
   0xc   :  { %1075 = vmatprep.subr.bf16.mxu0 %v1188_v12  ;;  %v1203_v27 = vld [vmem:[%s1556_s1 + $0xb0] sm:$0xff]   ;;  %v1209_v36 = vld [vmem:[%s1555_s0 + $0x1c] ss:$14 sps:$4 sm:$0xff]   ;;  %v1211_v38 = vld [vmem:[%s1555_s0 + $0x38] ss:$14 sps:$4 sm:$0xff]  }
   0xd   :  { %1096 = vmatpush3.bf16.msra.mxu1 %v1187_v11  ;;  %v1207_v35 = vld [vmem:[%s1555_s0] ss:$14 sps:$4 sm:$0xff]   ;;  %v1215_v40 = vld [vmem:[%s1556_s1 + $0xb8] sm:$0xff]   ;;  %v1217_v43 = vld [vmem:[%s1555_s0 + $0x4] ss:$14 sps:$4 sm:$0xff]   ;;  %v77_v47 = vrot.slane %v1209_v36, %v1402_v41  ;;  %v134_v48 = vrot.slane %v1211_v38, %v1402_v41 }
   0xe   :  { %1097 = vmatprep.subr.bf16.mxu1 %v1190_v14  ;;  %v1213_v39 = vld [vmem:[%s1555_s0 + $0x54] ss:$14 sps:$4 sm:$0xff]   ;;  %v1219_v45 = vld [vmem:[%s1555_s0 + $0x3c] ss:$14 sps:$4 sm:$0xff]   ;;  %v63_v46 = vrot.slane %v1207_v35, %v1402_v41  ;;  %v1220_v50 = vld [vmem:[%s1555_s0 + $0x58] ss:$14 sps:$4 sm:$0xff]   ;;  %v70_v51 = vrot.slane %v1217_v43, %v1402_v41 }
   0xf   :  { %1076 = vmatpush3.bf16.msra.mxu0 %v1189_v13  ;;  %v1218_v44 = vld [vmem:[%s1555_s0 + $0x20] ss:$14 sps:$4 sm:$0xff]   ;;  %v148_v49 = vrot.slane %v1213_v39, %v1402_v41  ;;  %v141_v53 = vrot.slane %v1219_v45, %v1402_v41  ;;  %v155_v60 = vrot.slane %v1220_v50, %v1402_v41  ;;  %v1226_v9 = vld [vmem:[%s1556_s1 + $0x158] sm:$0xff]  }
  0x10   :  { %1077 = vmatprep.subr.bf16.mxu0 %v1192_v16  ;;  %v84_v52 = vrot.slane %v1218_v44, %v1402_v41  ;;  %v86_v55 = vcombine.high %v63_v46, %v77_v47  ;;  %v85_v57 = vcombine.low %v63_v46, %v77_v47  ;;  %v1223_v6 = vld [vmem:[%s1556_s1 + $0x108] sm:$0xff]   ;;  %v1224_v7 = vld [vmem:[%s1556_s1 + $0x150] sm:$0xff]   ;;  %v1227_v10 = vld [vmem:[%s1556_s1 + $0x118] sm:$0xff]  }
  0x11   :  { %1098 = vmatpush3.bf16.msra.mxu1 %v1191_v15  ;;  %v157_v56 = vcombine.high %v134_v48, %v148_v49  ;;  %v156_v58 = vcombine.low %v134_v48, %v148_v49  ;;  %v159_v1 = vcombine.high %v141_v53, %v155_v60  ;;  %v158_v2 = vcombine.low %v141_v53, %v155_v60  ;;  %v1225_v8 = vld [vmem:[%s1556_s1 + $0x110] sm:$0xff]   ;;  %v1228_v11 = vld [vmem:[%s1556_s1 + $0x160] sm:$0xff]   ;;  %v1239_v14 = vld [vmem:[%s1555_s0 + $0xc] ss:$14 sps:$4 sm:$0x33]  }
  0x12   :  { %1099 = vmatprep.subr.bf16.mxu1 %v1194_v18  ;;  %v88_v59 = vcombine.high %v70_v51, %v84_v52  ;;  %v87_v61 = vcombine.low %v70_v51, %v84_v52  ;;  %v1236_v12 = vld [vmem:[%s1556_s1 + $0x180] sm:$0xff]   ;;  %v1237_v13 = vld [vmem:[%s1555_s0 + $0x8] ss:$14 sps:$4 sm:$0xff]  }
  0x13   :  { %1078 = vmatpush3.bf16.msra.mxu0 %v1193_v17  ;;  %v210_v62 = vpack.c.bf16 %v157_v56, %v86_v55  ;;  %v209_v63 = vpack.c.bf16 %v156_v58, %v85_v57  ;;  %v1229_v15 = vld [vmem:[%s1556_s1 + $0x120] sm:$0xff]   ;;  %v1242_v17 = vld [vmem:[%s1555_s0 + $0x28] ss:$14 sps:$4 sm:$0x33]   ;;  %v1235_v44 = vld [vmem:[%s1556_s1 + $0x138] sm:$0xff]  }
  0x14   :  { %1079 = vmatprep.subr.bf16.mxu0 %v1196_v20  ;;  %v212_v4 = vpack.c.bf16 %v159_v1, %v88_v59  ;;  %v211_v5 = vpack.c.bf16 %v158_v2, %v87_v61  ;;  %v1240_v16 = vld [vmem:[%s1555_s0 + $0x24] ss:$14 sps:$4 sm:$0xff]   ;;  %v1230_v18 = vld [vmem:[%s1556_s1 + $0x168] sm:$0xff]   ;;  %v106_v20 = vrot.slane %v1239_v14, %v1402_v41  ;;  %v1252_v49 = vld [vmem:[%s1558_s3 + $0x18] sm:$0xff]  }
  0x15   :  { %1100 = vmatpush3.bf16.msra.mxu1 %v1195_v19  ;;  %651 = vmatprep.mubr.bf16.mxu0 %v210_v62  ;;  %v99_v19 = vrot.slane %v1237_v13, %v1402_v41  ;;  %v1233_v38 = vld [vmem:[%s1556_s1 + $0x130] sm:$0xff]   ;;  %v1249_v46 = vld [vmem:[%s1558_s3] sm:$0xff]   ;;  %v1250_v47 = vld [vmem:[%s1558_s3 + $0x8] sm:$0xff]  }
  0x16   :  { %1101 = vmatprep.subr.bf16.mxu1 %v1198_v22  ;;  %692 = vmatprep.mubr.bf16.mxu1 %v212_v4  ;;  %v1245_v22 = vld [vmem:[%s1555_s0 + $0x44] ss:$14 sps:$4 sm:$0x33]   ;;  %v1254_v51 = vld [vmem:[%s1558_s3 + $0x28] sm:$0xff]   ;;  %v1256_v53 = vld [vmem:[%s1558_s3 + $0x38] sm:$0xff]  }
  0x17   :  { %1080 = vmatpush3.bf16.msra.mxu0 %v1197_v21  ;;  %v1243_v21 = vld [vmem:[%s1555_s0 + $0x40] ss:$14 sps:$4 sm:$0xff]  }
  0x18   :  { %1081 = vmatprep.subr.bf16.mxu0 %v1200_v24  ;;  %v113_v24 = vrot.slane %v1240_v16, %v1402_v41  ;;  %v170_v29 = vrot.slane %v1243_v21, %v1402_v41  ;;  %v1251_v48 = vld [vmem:[%s1558_s3 + $0x10] sm:$0xff]   ;;  %v1253_v50 = vld [vmem:[%s1558_s3 + $0x20] sm:$0xff]  }
  0x19   :  { %1102 = vmatpush3.bf16.msra.mxu1 %v1199_v23  ;;  %v1231_v23 = vld [vmem:[%s1556_s1 + $0x128] sm:$0xff]   ;;  %v1255_v52 = vld [vmem:[%s1558_s3 + $0x30] sm:$0xff]   ;;  %v1004_v56 = vld [vmem:[%s1557_s2] ss:$0 sm:$0xff] }
  0x1a   :  { %1103 = vmatprep.subr.bf16.mxu1 %v1202_v26  ;;  %v1246_v26 = vld [vmem:[%s1555_s0 + $0x5c] ss:$14 sps:$4 sm:$0xff]  }
  0x1b   :  { %1082 = vmatpush3.bf16.msra.mxu0 %v1201_v25  ;;  %v120_v25 = vrot.slane %v1242_v17, %v1402_v41  ;;  %v184_v32 = vrot.slane %v1246_v26, %v1402_v41 }
  0x1c   :  { %1083 = vmatprep.subr.bf16.mxu0 %v1204_v28  ;;  %v1232_v28 = vld [vmem:[%s1556_s1 + $0x170] sm:$0xff]  }
  0x1d   :  { %1104 = vmatpush3.bf16.msra.mxu1 %v1203_v27  ;;  %v1248_v27 = vld [vmem:[%s1555_s0 + $0x60] ss:$14 sps:$4 sm:$0x33]   ;;  %v123_v35 = vcombine.low %v106_v20, %v120_v25  ;;  %v193_v36 = vcombine.high %v170_v29, %v184_v32  ;;  %v192_v43 = vcombine.low %v170_v29, %v184_v32 }
  0x1e   :  { %1105 = vmatprep.subr.bf16.mxu1 %v1206_v31  ;;  %v122_v31 = vcombine.high %v99_v19, %v113_v24  ;;  %v191_v33 = vrot.slane %v1248_v27, %v1402_v41  ;;  %v1055_v27 = vld [vmem:[%s1559_s4] ss:$0 sm:$0xff] }
  0x1f   :  { %1084 = vmatpush3.bf16.msra.mxu0 %v1205_v30  ;;  %v177_v30 = vrot.slane %v1245_v22, %v1402_v41  ;;  %v121_v41 = vcombine.low %v99_v19, %v113_v24  ;;  %v1260_v24 = vmov 1966171168  }
  0x20   :  { %1113 = vmatprep.subr.bf16.mxu0 %v1216_v42  ;;  %v214_v39 = vpack.c.bf16 %v193_v36, %v122_v31  ;;  %v1234_v42 = vld [vmem:[%s1556_s1 + $0x178] sm:$0xff]   ;;  %v902_v25 = vunpack.c.l.s4 %v1260_v24 }
  0x21   :  { %1106 = vmatpush3.bf16.msra.mxu1 %v1215_v40  ;;  %v194_v37 = vcombine.low %v177_v30, %v191_v33  ;;  %v213_v45 = vpack.c.bf16 %v192_v43, %v121_v41 }
  0x22   :  { %1146 = vmatprep.subr.bf16.mxu1 %v1258_v54  ;;  %652 = vmatmul.mubr.bf16.vlgmr.msra.gmra.mrb[0].mxu0 %v209_v63  ;;  %v903_v26 = vunpack.c.0.s8 %v902_v25 }
  0x23   :  { %1114 = vmatpush3.bf16.msra.mxu0 %v1221_v0  ;;  %v215_v40 = vpack.c.bf16 %v194_v37, %v123_v35  ;;  %733 = vmatprep.mubr.bf16.mxu0 %v214_v39 }
  0x24   :  { %1115 = vmatprep.subr.bf16.mxu0 %v1222_v3  ;;  %693 = vmatmul.mubr.bf16.vlgmr.msra.gmra.mrb[0].mxu1 %v211_v5  ;;  %v906_v33 = vsub.s32 %v903_v26, %v1384_v34 }
  0x25   :  { %1148 = vmatprep.mubr.msk.bf16.mxu1 %vm1259_vm0, %v1258_v54  ;;  %1147 = vmatpush3.bf16.msra.mxu1 %v1236_v12 }
  0x26   :  { %1152 = vmatprep.subr.bf16.mxu1 %v1258_v54 }
  0x27   :  { %1116 = vmatpush3.bf16.msra.mxu0 %v1223_v6 }
  0x28   :  { %1117 = vmatprep.subr.bf16.mxu0 %v1224_v7 }
  0x2b   :  { %1118 = vmatpush3.bf16.msra.mxu0 %v1225_v8 }
  0x2c   :  { %1119 = vmatprep.subr.bf16.mxu0 %v1226_v9  ;;  %1149 = vmatmul.mubr.msk.bf16.vlgmr.msra.gmra.mrb[4].mxu1 %vm615_vm1, %v215_v40 }
  0x2d   :  { %1168 = vmatprep.mubr.msk.bf16.mxu1 %vm1259_vm0, %v1258_v54  ;;  %1153 = vmatpush3.bf16.msra.mxu1 %v1249_v46 }
  0x2e   :  { %1154 = vmatprep.subr.bf16.mxu1 %v1258_v54 }
  0x2f   :  { %1120 = vmatpush3.bf16.msra.mxu0 %v1227_v10 }
  0x30   :  { %1121 = vmatprep.subr.bf16.mxu0 %v1228_v11 }
  0x31   :  { %1155 = vmatpush3.bf16.msra.mxu1 %v1250_v47 }
  0x32   :  { %1156 = vmatprep.subr.bf16.mxu1 %v1258_v54 }
  0x33   :  { %1122 = vmatpush3.bf16.msra.mxu0 %v1229_v15 }
  0x34   :  { %1123 = vmatprep.subr.bf16.mxu0 %v1230_v18 }
  0x35   :  { %1157 = vmatpush3.bf16.msra.mxu1 %v1251_v48 }
  0x36   :  { %1158 = vmatprep.subr.bf16.mxu1 %v1258_v54 }
  0x37   :  { %1124 = vmatpush3.bf16.msra.mxu0 %v1231_v23 }
  0x38   :  { %1125 = vmatprep.subr.bf16.mxu0 %v1232_v28 }
  0x39   :  { %1159 = vmatpush3.bf16.msra.mxu1 %v1252_v49 }
  0x3a   :  { %1160 = vmatprep.subr.bf16.mxu1 %v1258_v54 }
  0x3b   :  { %1126 = vmatpush3.bf16.msra.mxu0 %v1233_v38 }
  0x3c   :  { %1127 = vmatprep.subr.bf16.mxu0 %v1234_v42 }
  0x3d   :  { %1161 = vmatpush3.bf16.msra.mxu1 %v1253_v50 }
  0x3e   :  { %1162 = vmatprep.subr.bf16.mxu1 %v1258_v54 }
  0x3f   :  { %1128 = vmatpush3.bf16.msra.mxu0 %v1235_v44 }
  0x41   :  { %1163 = vmatpush3.bf16.msra.mxu1 %v1254_v51 }
  0x42   :  { %734 = vmatmul.mubr.bf16.vlgmr.msra.gmra.mrb[4].mxu0 %v213_v45  ;;  %1164 = vmatprep.subr.bf16.mxu1 %v1258_v54 }
  0x45   :  { %1165 = vmatpush3.bf16.msra.mxu1 %v1255_v52 }
  0x46   :  { %1166 = vmatprep.subr.bf16.mxu1 %v1258_v54 }
  0x49   :  { %1167 = vmatpush3.bf16.msra.mxu1 %v1256_v53 }
  0xf5   :  { %v1085_v55 = vpop.f32.mrb[0].mxu0 }
  0xf6   :  { %v1086_v57 = vpop.f32.mrb[1].mxu0 }
  0xf7   :  { %v1087_v58 = vadd.f32 %v1086_v57, %v1085_v55  ;;  %v1088_v59 = vpop.f32.mrb[2].mxu0  ;;  %v1107_v60 = vpop.f32.mrb[0].mxu1 }
  0xf8   :  { %v1089_v61 = vpop.f32.mrb[3].mxu0  ;;  %v1108_v0 = vpop.f32.mrb[1].mxu1 }
  0xf9   :  { %v654_v62 = vadd.f32 %v1087_v58, %v1004_v56  ;;  %v1090_v63 = vadd.f32 %v1089_v61, %v1088_v59  ;;  %v1109_v1 = vadd.f32 %v1108_v0, %v1107_v60  ;;  %v1110_v54 = vpop.f32.mrb[2].mxu1 }
  0xfa   :  { %v1111_v3 = vpop.f32.mrb[3].mxu1 }
  0xfb   :  { %v657_v2 = vadd.f32 %v1090_v63, %v1004_v56  ;;  %v695_v4 = vadd.f32 %v1109_v1, %v654_v62  ;;  %v1112_v5 = vadd.f32 %v1111_v3, %v1110_v54 }
  0xfd   :  { %v698_v6 = vadd.f32 %v1112_v5, %v657_v2 }
  0xff   :  { %v776_v7 = vpop.f32.mrb[4].mxu1 }
 0x100   :  { %v1150_v8 = vpop.f32.mrb[5].mxu1 }
 0x101   :  { %v779_v9 = vpop.f32.mrb[6].mxu1 }
 0x102   :  { %v1151_v10 = vpop.f32.mrb[7].mxu1 }
 0x115   :  { %v1129_v11 = vpop.f32.mrb[4].mxu0 }
 0x116   :  { %v1130_v12 = vpop.f32.mrb[5].mxu0 }
 0x117   :  { %v1131_v13 = vadd.f32 %v1130_v12, %v1129_v11  ;;  %v1132_v14 = vpop.f32.mrb[6].mxu0 }
 0x118   :  { %v1133_v15 = vpop.f32.mrb[7].mxu0 }
 0x119   :  { %v736_v16 = vadd.f32 %v1131_v13, %v695_v4  ;;  %v1134_v17 = vadd.f32 %v1133_v15, %v1132_v14 }
 0x11b   :  { %v777_v18 = vadd.f32 %v776_v7, %v736_v16  ;;  %v739_v19 = vadd.f32 %v1134_v17, %v698_v6 }
 0x11d   :  { %v780_v20 = vadd.f32 %v779_v9, %v739_v19  ;;  %v783_v21 = vmax.f32 %v777_v18, 0.0 }
 0x11f   :  { %v784_v22 = vmax.f32 %v780_v20, 0.0 }
 0x121   :  { %v785_v23 = vpack.c.bf16 %v784_v22, %v783_v21 }
 0x123   :  { %1169 = vmatmul.mubr.bf16.vlgmr.msra.gmra.mrb[8].mxu1 %v785_v23 }
 0x1f6   :  { %v891_v28 = vpop.f32.mrb[8].mxu1 }
 0x1f7   :  { %v1170_v29 = vpop.f32.mrb[9].mxu1  ;;  %v892_v31 = vadd.f32 %v1055_v27, %v891_v28 }
 0x1f8   :  { %v894_v30 = vpop.f32.mrb[10].mxu1 }
 0x1f9   :  { %v895_v32 = vadd.f32 %v1055_v27, %v894_v30  ;;  %v1171_v35 = vpop.f32.mrb[11].mxu1 }
 0x1fb   :  { %v898_v36 = vpack.c.bf16 %v895_v32, %v892_v31 }
 0x1fd   :  { %v907_v37 = vrot.slane %v898_v36, %v906_v33 }
 0x1ff   :  { %1065 = vst.sshfl [vmem:[#allocation2] sm:$0x1 pattern:$0x73625140] %v907_v37 }
 0x206   :  { %v982_v38 = vld [vmem:[#allocation2] sm:$0x1] }
 0x207   :  { %983 = vst [vmem:[%s1560_s5] sm:$0x1] %v982_v38 }

</bundles_post_ra>
